<compile_context>
chip_gen: v6e
topology: v6e:2x2x1
jax: 0.10.0
libtpu: 0.0.40
codegen_flags: <defaults>
</compile_context>

<pallas_src>
import functools

import jax
import jax.numpy as jnp
from jax import lax
from jax.experimental import pallas as pl
from jax.experimental.pallas import tpu as pltpu


def _drr_kernel(user_ref, item_ref, w_ref, b_ref, out_ref, *, E, PAD):
    user = user_ref[...]                  # (B, 1, E)
    item = item_ref[...]                  # (B, S, E)
    w = w_ref[...]                        # (1, 1, E)
    b = b_ref[...]                        # (1, 1, S)

    B = item.shape[0]

    # Attention logits on the MXU: eij[b, 0, s] = sum_e item[b, s, e] * w[e]
    wq = jnp.broadcast_to(w, (B, 1, E))   # hoisted single broadcast of the loaded tile
    eij = jnp.einsum(
        "bqe,bse->bqs", wq, item,
        preferred_element_type=jnp.float32,
        precision=lax.Precision.HIGHEST,
    )                                     # (B, 1, S)
    eij = jnp.tanh(eij + b)               # bias broadcasts over batch

    # Softmax over the step dim (exp without max-subtraction is safe: tanh bounds eij to [-1, 1]).
    a = jnp.exp(eij)                                         # (B, 1, S)
    denom = jnp.sum(a, axis=-1, keepdims=True) + 1e-10       # (B, 1, 1)
    # approx=True (EUP vrcp) is cheaper but can introduce ~1e-3 relative error;
    # keep the exact reciprocal to stay within the reference tolerance.
    a = a * pl.reciprocal(denom, approx=False)

    # Weighted average over the step dim, also on the MXU.
    drr = jnp.einsum(
        "bqs,bse->bqe", a, item,
        preferred_element_type=jnp.float32,
        precision=lax.Precision.HIGHEST,
    )                                     # (B, 1, E)

    # Single lane-dense store: cat([user, user*drr, drr], pad-to-128-lanes).
    pieces = [user, user * drr, drr]
    if PAD:
        pieces.append(jnp.zeros((B, 1, PAD), jnp.float32))
    out_ref[...] = jnp.concatenate(pieces, axis=-1)


def drr_ave_state_representation(user, item, weight, bias):
    """user: (B, E), item: (B, S, E), weight: (E, 1), bias: (S,) -> (B, 3E)."""
    B, E = user.shape
    _, S, _ = item.shape

    out_w = ((3 * E + 127) // 128) * 128      # lane-dense (multiple of 128) output width
    pad = out_w - 3 * E

    user3 = user.astype(jnp.float32).reshape(B, 1, E)
    item32 = item.astype(jnp.float32)
    w3 = weight.astype(jnp.float32).reshape(1, 1, E)
    b3 = bias.astype(jnp.float32).reshape(1, 1, S)

    kernel = functools.partial(_drr_kernel, E=E, PAD=pad)

    out_padded = pl.pallas_call(
        kernel,
        out_shape=jax.ShapeDtypeStruct((B, 1, out_w), jnp.float32),
        grid=(1,),
        in_specs=[
            pl.BlockSpec((B, 1, E), lambda i: (0, 0, 0)),
            pl.BlockSpec((B, S, E), lambda i: (0, 0, 0)),
            pl.BlockSpec((1, 1, E), lambda i: (0, 0, 0)),
            pl.BlockSpec((1, 1, S), lambda i: (0, 0, 0)),
        ],
        out_specs=pl.BlockSpec((B, 1, out_w), lambda i: (0, 0, 0)),
        compiler_params=pltpu.CompilerParams(
            dimension_semantics=("arbitrary",)),
    )(user3, item32, w3, b3)

    # Slice the lane padding back off outside the kernel.
    return out_padded[:, 0, :3 * E]


def _reference(user, item, weight, bias):
    """Pure-JAX reference mirroring the PyTorch forward (exact f32 elementwise math)."""
    B, S, E = item.shape
    eij = jnp.sum(item * weight.reshape(1, 1, E), axis=-1) + bias[None, :]
    eij = jnp.tanh(eij)
    a = jnp.exp(eij)
    a = a / (jnp.sum(a, axis=1, keepdims=True) + 1e-10)
    drr = jnp.sum(item * a[:, :, None], axis=1)
    return jnp.concatenate([user, user * drr, drr], axis=1)


if __name__ == "__main__":
    # Small shapes consistent with the module: embedding_dim=32, state_size=8, batch=2.
    B, S, E = 2, 8, 32

    key = jax.random.PRNGKey(0)
    k_user, k_item, k_w = jax.random.split(key, 3)

    user = jax.random.normal(k_user, (B, E), dtype=jnp.float32)
    item = jax.random.normal(k_item, (B, S, E), dtype=jnp.float32)

    # Attention parameters: weight (E, 1) kaiming-uniform-like init, bias (S,) zeros.
    bound = jnp.sqrt(6.0 / E)  # kaiming_uniform fan_in = E
    weight = jax.random.uniform(k_w, (E, 1), minval=-bound, maxval=bound,
                                dtype=jnp.float32)
    bias = jnp.zeros((S,), dtype=jnp.float32)

    out = drr_ave_state_representation(user, item, weight, bias)
    out = jax.block_until_ready(out)

    ref = _reference(user, item, weight, bias)
    assert out.shape == (B, 3 * E)
    # Slightly relaxed tolerance: the kernel accumulates on the MXU (f32 HIGHEST),
    # the reference on the VPU, so summation order differs by a few ulps.
    assert jnp.allclose(out, ref, atol=1e-4, rtol=1e-4), "mismatch vs reference"

    print("KERNEL_OK")
</pallas_src>

<mosaic_0001>
module attributes {stable_mosaic.version = 11 : i64} {
  func.func @_drr_kernel(%arg0: i32, %arg1: memref<2x1x32xf32, #tpu.memory_space<vmem>>, %arg2: memref<2x8x32xf32, #tpu.memory_space<vmem>>, %arg3: memref<1x1x32xf32, #tpu.memory_space<vmem>>, %arg4: memref<1x1x8xf32, #tpu.memory_space<vmem>>, %arg5: memref<2x1x128xf32, #tpu.memory_space<vmem>>) attributes {dimension_semantics = [#tpu.dimension_semantics<arbitrary>], iteration_bounds = array<i64: 1>, scalar_prefetch = 0 : i64, scratch_operands = 0 : i64, tpu.core_type = #tpu.core_type<tc>, window_params = [{pipeline_mode = #tpu.pipeline_mode<synchronous>, transform_indices = @transform_0, window_bounds = array<i64: 2, 1, 32>}, {pipeline_mode = #tpu.pipeline_mode<synchronous>, transform_indices = @transform_1, window_bounds = array<i64: 2, 8, 32>}, {pipeline_mode = #tpu.pipeline_mode<synchronous>, transform_indices = @transform_2, window_bounds = array<i64: 1, 1, 32>}, {pipeline_mode = #tpu.pipeline_mode<synchronous>, transform_indices = @transform_3, window_bounds = array<i64: 1, 1, 8>}, {pipeline_mode = #tpu.pipeline_mode<synchronous>, transform_indices = @transform_4, window_bounds = array<i64: 2, 1, 128>}]} {
    %c0 = arith.constant 0 : index
    %c0_0 = arith.constant 0 : index
    %c0_1 = arith.constant 0 : index
    %0 = vector.load %arg1[%c0, %c0_0, %c0_1] : memref<2x1x32xf32, #tpu.memory_space<vmem>>, vector<2x1x32xf32>
    %c0_2 = arith.constant 0 : index
    %c0_3 = arith.constant 0 : index
    %c0_4 = arith.constant 0 : index
    %1 = vector.load %arg2[%c0_2, %c0_3, %c0_4] : memref<2x8x32xf32, #tpu.memory_space<vmem>>, vector<2x8x32xf32>
    %c0_5 = arith.constant 0 : index
    %c0_6 = arith.constant 0 : index
    %c0_7 = arith.constant 0 : index
    %2 = vector.load %arg3[%c0_5, %c0_6, %c0_7] : memref<1x1x32xf32, #tpu.memory_space<vmem>>, vector<1x1x32xf32>
    %c0_8 = arith.constant 0 : index
    %c0_9 = arith.constant 0 : index
    %c0_10 = arith.constant 0 : index
    %3 = vector.load %arg4[%c0_8, %c0_9, %c0_10] : memref<1x1x8xf32, #tpu.memory_space<vmem>>, vector<1x1x8xf32>
    %4 = vector.shape_cast %2 : vector<1x1x32xf32> to vector<1x1x32xf32>
    %5 = vector.broadcast %4 : vector<1x1x32xf32> to vector<2x1x32xf32>
    "tpu.trace_start"() <{level = 10 : i32, message = "bqe,bse->bqs"}> : () -> ()
    %cst = arith.constant dense<0.000000e+00> : vector<2x1x8xf32>
    %6 = tpu.matmul %5, %1, %cst {dimension_numbers = #tpu.dot_dimension_numbers<[2], [2], [1], [1], [0, 0, 0, 1, 1, 1], [0], [0]>, precision = #tpu.contract_precision<fp32>} : vector<2x1x32xf32>, vector<2x8x32xf32>, vector<2x1x8xf32> -> vector<2x1x8xf32>
    "tpu.trace_stop"() : () -> ()
    %7 = vector.broadcast %3 : vector<1x1x8xf32> to vector<2x1x8xf32>
    %8 = arith.addf %6, %7 : vector<2x1x8xf32>
    %9 = math.tanh %8 : vector<2x1x8xf32>
    %10 = math.exp %9 : vector<2x1x8xf32>
    %cst_11 = arith.constant dense<0.000000e+00> : vector<2x1xf32>
    %11 = vector.multi_reduction <add>, %10, %cst_11 [2] : vector<2x1x8xf32> to vector<2x1xf32>
    %12 = vector.shape_cast %11 : vector<2x1xf32> to vector<2x1x1xf32>
    %cst_12 = arith.constant 1.000000e-10 : f32
    %13 = vector.broadcast %cst_12 : f32 to vector<2x1x1xf32>
    %14 = arith.addf %12, %13 : vector<2x1x1xf32>
    %15 = tpu.reciprocal %14 : vector<2x1x1xf32> -> vector<2x1x1xf32>
    %16 = vector.broadcast %15 : vector<2x1x1xf32> to vector<2x1x8xf32>
    %17 = arith.mulf %10, %16 : vector<2x1x8xf32>
    "tpu.trace_start"() <{level = 10 : i32, message = "bqs,bse->bqe"}> : () -> ()
    %cst_13 = arith.constant dense<0.000000e+00> : vector<2x1x32xf32>
    %18 = tpu.matmul %17, %1, %cst_13 {dimension_numbers = #tpu.dot_dimension_numbers<[2], [1], [1], [2], [0, 0, 0, 1, 1, 2], [0], [0]>, precision = #tpu.contract_precision<fp32>} : vector<2x1x8xf32>, vector<2x8x32xf32>, vector<2x1x32xf32> -> vector<2x1x32xf32>
    "tpu.trace_stop"() : () -> ()
    %19 = arith.mulf %0, %18 : vector<2x1x32xf32>
    %cst_14 = arith.constant 0.000000e+00 : f32
    %20 = vector.broadcast %cst_14 : f32 to vector<2x1x32xf32>
    %21 = tpu.concatenate %0, %19, %18, %20 in 2 : vector<2x1x32xf32>, vector<2x1x32xf32>, vector<2x1x32xf32>, vector<2x1x32xf32> -> vector<2x1x128xf32>
    %c0_15 = arith.constant 0 : index
    %c0_16 = arith.constant 0 : index
    %c0_17 = arith.constant 0 : index
    %22 = vector.load %arg5[%c0_15, %c0_16, %c0_17] : memref<2x1x128xf32, #tpu.memory_space<vmem>>, vector<2x1x128xf32>
    tpu.vector_store %arg5[%c0_15, %c0_16, %c0_17], %21 {strides = array<i32>} : memref<2x1x128xf32, #tpu.memory_space<vmem>>, vector<2x1x128xf32>,
    return
  }
  func.func @transform_0(%arg0: i32) -> (i32, i32, i32) {
    %c0_i32 = arith.constant 0 : i32
    %c0_i32_0 = arith.constant 0 : i32
    %c0_i32_1 = arith.constant 0 : i32
    %c0_i32_2 = arith.constant 0 : i32
    return %c0_i32, %c0_i32_0, %c0_i32_1 : i32, i32, i32
  }
  func.func @transform_1(%arg0: i32) -> (i32, i32, i32) {
    %c0_i32 = arith.constant 0 : i32
    %c0_i32_0 = arith.constant 0 : i32
    %c0_i32_1 = arith.constant 0 : i32
    %c0_i32_2 = arith.constant 0 : i32
    return %c0_i32, %c0_i32_0, %c0_i32_1 : i32, i32, i32
  }
  func.func @transform_2(%arg0: i32) -> (i32, i32, i32) {
    %c0_i32 = arith.constant 0 : i32
    %c0_i32_0 = arith.constant 0 : i32
    %c0_i32_1 = arith.constant 0 : i32
    %c0_i32_2 = arith.constant 0 : i32
    return %c0_i32, %c0_i32_0, %c0_i32_1 : i32, i32, i32
  }
  func.func @transform_3(%arg0: i32) -> (i32, i32, i32) {
    %c0_i32 = arith.constant 0 : i32
    %c0_i32_0 = arith.constant 0 : i32
    %c0_i32_1 = arith.constant 0 : i32
    %c0_i32_2 = arith.constant 0 : i32
    return %c0_i32, %c0_i32_0, %c0_i32_1 : i32, i32, i32
  }
  func.func @transform_4(%arg0: i32) -> (i32, i32, i32) {
    %c0_i32 = arith.constant 0 : i32
    %c0_i32_0 = arith.constant 0 : i32
    %c0_i32_1 = arith.constant 0 : i32
    %c0_i32_2 = arith.constant 0 : i32
    return %c0_i32, %c0_i32_0, %c0_i32_1 : i32, i32, i32
  }
}

</mosaic_0001>

<bundles_post_ra>
// kernel: tpu_custom_call.1
= control target key start
LH: loop header
LB: loop body
LE: loop exit
PB: predicated region body
PF: predicated region fallthrough
CT: control target
= control target key end

     0   :  { %9 = vsyncpa [#allocation3], 0  ;;  %s2335_s0 = inlined_call_operand.hbm [shape: f32[2,1,32], index: 0, kind: input, shape index: {}]   ;;  %s2336_s1 = inlined_call_operand.hbm [shape: f32[2,8,32], index: 1, kind: input, shape index: {}]   ;;  %s2337_s2 = inlined_call_operand.vmem [shape: f32[1,1,32], index: 2, kind: input, shape index: {}]   ;;  %s2338_s3 = inlined_call_operand.vmem [shape: f32[1,1,8], index: 3, kind: input, shape index: {}]   ;;  %s2339_s4 = inlined_call_operand.hbm [shape: f32[2,1,128], index: 4, kind: output, shape index: {}]  }
   0x1   :  { %10 = vsyncpa [#allocation6], 0 }
   0x2   :  { %11 = vsyncpa [#allocation4], 0  ;;  %s2183_s15 = smov [#allocation2]  }
   0x3   :  { %s17_s16 = sshll.u32 %s2183_s15, 4  ;;  %s18_s16 = int_to_ptr.vmem [resolvable:$true] %s17_s16 }
   0x4   :  { %s2125_s17 = scalar_lea.vmem %s18_s16, 32  ;;  %p2130_p1 = scmp.lt.s32.totalorder %s18_s16, %s18_s16 }
   0x5   :  { %p2126_p0 = scmp.ne.s32.totalorder %s18_s16, %s2125_s17  ;;  %p2131_p2 = scmp.lt.s32.totalorder %s2125_s17, %s2125_s17 }
   0x7   :  { %p2132_p3 = por %p2131_p2, %p2130_p1 }
   0x9   :  { %p2133_p4 = pnand %p2132_p3, %p2126_p0 }
   0xb   :  { %2136 = shalt.err (!%p2133_p4)
}
   0xc   :  { %s2184_s18 = smov 16   ;;  %s2185_s19 = smov 1  }
   0xd   :  { %23 = dma.hbm_to_vmem [thread:$0]  %s2335_s0, 32, %s18_s16, [#allocation3], %s2184_s18, %s2184_s18, %s2185_s19  }
   0xe   :  { %s2186_s22 = smov [#allocation5]  }
   0xf   :  { %s29_s23 = sshll.u32 %s2186_s22, 4  ;;  %s30_s23 = int_to_ptr.vmem [resolvable:$true] %s29_s23 }
  0x10   :  { %s2145_s24 = scalar_lea.vmem %s30_s23, 256  ;;  %p2150_p6 = scmp.lt.s32.totalorder %s30_s23, %s30_s23 }
  0x11   :  { %p2146_p5 = scmp.ne.s32.totalorder %s30_s23, %s2145_s24  ;;  %p2151_p7 = scmp.lt.s32.totalorder %s2145_s24, %s2145_s24 }
  0x13   :  { %p2152_p8 = por %p2151_p7, %p2150_p6 }
  0x15   :  { %p2153_p9 = pnand %p2152_p8, %p2146_p5 }
  0x17   :  { %2156 = shalt.err (!%p2153_p9)
}
  0x18   :  { %s2187_s25 = smov 128   ;;  %s2188_s26 = smov 8  }
  0x19   :  { %35 = dma.hbm_to_vmem [thread:$0]  %s2336_s1, 256, %s30_s23, [#allocation6], %s2187_s25, %s2187_s25, %s2188_s26  }
  0x1a   :  { %2177 = dma.done.wait [#allocation3], 32  }
  0x1b   :  { %2178 = vsyncadd [#allocation3], 4294967264 }
  0x1c   :  { %2179 = dma.done.wait [#allocation6], 256  }
  0x1d   :  { %2180 = vsyncadd [#allocation6], 4294967040  ;;  %v2189_v0 = vmov 0.0   ;;  %vm2190_vm0 = vmmov 0   ;;  %vm52_vm1 = vcmask 261120   ;;  %v2234_v1 = vld [vmem:[#allocation5] sm:$0xff] }
  0x1e   :  { %1974 = vmatprep.subr.mxu0 %v2189_v0  ;;  %1976 = vmatprep.mubr.msk.f32.mxu0 %vm2190_vm0, %v2189_v0  ;;  %v50_v2 = vld [vmem:[%s2337_s2] sm:$0x1]  ;;  %v2239_v3 = vld [vmem:[#allocation5 + $0x8] sm:$0xff]  ;;  %v57_v4 = vsel %vm52_vm1, %v2234_v1, 0  ;;  %v2276_v22 = vand.u32 4294901760, %v2234_v1  ;;  %vm960_vm2 = vcmask 57344  }
  0x1f   :  { %1979 = vmatprep.subr.mxu1 %v2189_v0  ;;  %1981 = vmatprep.mubr.msk.f32.mxu1 %vm2190_vm0, %v2189_v0  ;;  %v54_v5 = vsel %vm52_vm1, %v50_v2, 0  ;;  %v506_v6 = vsel %vm52_vm1, %v2239_v3, 0  ;;  %v90_v7 = vand.u32 4294901760, %v57_v4  ;;  %v51_v23 = vld [vmem:[%s2338_s3] sm:$0x1]  ;;  %vm973_vm3 = vcmask 64512  }
  0x20   :  { %v125_v8 = vand.u32 4294901760, %v54_v5  ;;  %v539_v11 = vand.u32 4294901760, %v506_v6  ;;  %s2191_s3 = smov 64   ;;  %s2192_s30 = smov 32   ;;  %vm1900_vm4 = vcmask 523264   ;;  %vm1903_vm5 = vcmask 785408  }
  0x21   :  { %1975 = vmatpush3.xpose.msra.mxu0 %v90_v7  ;;  %v167_v10 = vsub.f32 %v57_v4, %v90_v7  ;;  %s2193_s5 = smov [#allocation7]  }
  0x22   :  { %v126_v9 = vsub.f32 %v54_v5, %v125_v8  ;;  %1984 = vmatprep.subr.mxu0 %v2189_v0  ;;  %v616_v16 = vsub.f32 %v506_v6, %v539_v11  ;;  %s1913_s6 = sshll.u32 %s2193_s5, 4  ;;  %s1914_s6 = int_to_ptr.vmem [resolvable:$true] %s1913_s6 }
  0x23   :  { %v168_v13 = vand.u32 4294901760, %v167_v10  ;;  %s2157_s7 = scalar_lea.vmem %s1914_s6, 32  ;;  %p2162_p11 = scmp.lt.s32.totalorder %s1914_s6, %s1914_s6 }
  0x24   :  { %v127_v12 = vand.u32 4294901760, %v126_v9  ;;  %v617_v19 = vand.u32 4294901760, %v616_v16  ;;  %p2158_p10 = scmp.ne.s32.totalorder %s1914_s6, %s2157_s7  ;;  %p2163_p12 = scmp.lt.s32.totalorder %s2157_s7, %s2157_s7 }
  0x25   :  { %v169_v15 = vsub.f32 %v167_v10, %v168_v13 }
  0x26   :  { %v128_v14 = vsub.f32 %v126_v9, %v127_v12  ;;  %v618_v20 = vsub.f32 %v616_v16, %v617_v19  ;;  %p2164_p13 = por %p2163_p12, %p2162_p11 }
  0x27   :  { %v170_v18 = vand.u32 4294901760, %v169_v15 }
  0x28   :  { %v129_v17 = vand.u32 4294901760, %v128_v14  ;;  %v619_v21 = vand.u32 4294901760, %v618_v20  ;;  %p2165_p0 = pnand %p2164_p13, %p2158_p10 }
  0x29   :  { %1980 = vmatpush3.xpose.msra.mxu1 %v170_v18 }
  0x2a   :  { %1977 = vmatmul.mubr.f32.vlgmr.msra.gmra.mxu0 %v129_v17  ;;  %1989 = vmatprep.subr.mxu1 %v2189_v0 }
  0x2b   :  { %1985 = vmatpush3.xpose.msra.mxu0 %v167_v10  ;;  %1986 = vmatprep.mubr.msk.f32.mxu0 %vm2190_vm0, %v2189_v0 }
  0x2c   :  { %1994 = vmatprep.subr.mxu0 %v2189_v0  ;;  %1982 = vmatmul.mubr.f32.vlgmr.msra.gmra.mxu1 %v125_v8 }
  0x2d   :  { %1990 = vmatpush3.xpose.msra.mxu1 %v90_v7  ;;  %1991 = vmatprep.mubr.msk.f32.mxu1 %vm2190_vm0, %v2189_v0 }
  0x2e   :  { %1987 = vmatmul.mubr.f32.vlgmr.msra.gmra.mxu0 %v126_v9  ;;  %1999 = vmatprep.subr.mxu1 %v2189_v0 }
  0x2f   :  { %1995 = vmatpush3.xpose.msra.mxu0 %v168_v13  ;;  %1996 = vmatprep.mubr.msk.f32.mxu0 %vm2190_vm0, %v2189_v0  ;;  %v1457_v13 = vand.u32 4294901760, %v2239_v3 }
  0x30   :  { %1992 = vmatmul.mubr.f32.vlgmr.msra.gmra.mxu1 %v127_v12  ;;  %2004 = vmatprep.subr.mxu0 %v2189_v0 }
  0x31   :  { %2000 = vmatpush3.xpose.msra.mxu1 %v90_v7  ;;  %2001 = vmatprep.mubr.msk.f32.mxu1 %vm2190_vm0, %v2189_v0  ;;  %v1085_v7 = vsub.f32 %v2234_v1, %v2276_v22 }
  0x32   :  { %1997 = vmatmul.mubr.f32.vlgmr.msra.gmra.mxu0 %v125_v8  ;;  %2009 = vmatprep.subr.mxu1 %v2189_v0 }
  0x33   :  { %2005 = vmatpush3.xpose.msra.mxu0 %v539_v11  ;;  %2006 = vmatprep.mubr.msk.f32.mxu0 %vm2190_vm0, %v2189_v0 }
  0x34   :  { %2002 = vmatmul.mubr.f32.vlgmr.msra.gmra.mxu1 %v125_v8  ;;  %2014 = vmatprep.subr.mxu0 %v2189_v0 }
  0x35   :  { %2010 = vmatpush3.xpose.msra.mxu1 %v619_v21  ;;  %2011 = vmatprep.mubr.msk.f32.mxu1 %vm2190_vm0, %v2189_v0 }
  0x36   :  { %2007 = vmatmul.mubr.f32.vlgmr.msra.gmra.mxu0 %v129_v17  ;;  %2019 = vmatprep.subr.mxu1 %v2189_v0  ;;  %v1534_v17 = vsub.f32 %v2239_v3, %v1457_v13 }
  0x37   :  { %2015 = vmatpush3.xpose.msra.mxu0 %v616_v16  ;;  %2016 = vmatprep.mubr.msk.f32.mxu0 %vm2190_vm0, %v2189_v0 }
  0x38   :  { %2012 = vmatmul.mubr.f32.vlgmr.msra.gmra.mxu1 %v125_v8  ;;  %2024 = vmatprep.subr.mxu0 %v2189_v0  ;;  %v1535_v20 = vand.u32 4294901760, %v1534_v17 }
  0x39   :  { %2020 = vmatpush3.xpose.msra.mxu1 %v539_v11  ;;  %2021 = vmatprep.mubr.msk.f32.mxu1 %vm2190_vm0, %v2189_v0 }
  0x3a   :  { %2017 = vmatmul.mubr.f32.vlgmr.msra.gmra.mxu0 %v126_v9  ;;  %2029 = vmatprep.subr.mxu1 %v2189_v0 }
  0x3b   :  { %2025 = vmatpush3.xpose.msra.mxu0 %v617_v19  ;;  %2026 = vmatprep.mubr.msk.f32.mxu0 %vm2190_vm0, %v2189_v0 }
  0x3c   :  { %2022 = vmatmul.mubr.f32.vlgmr.msra.gmra.mxu1 %v127_v12  ;;  %2034 = vmatprep.subr.mxu0 %v2189_v0 }
  0x3d   :  { %2030 = vmatpush3.xpose.msra.mxu1 %v539_v11  ;;  %2031 = vmatprep.mubr.msk.f32.mxu1 %vm2190_vm0, %v2189_v0 }
  0x3e   :  { %2027 = vmatmul.mubr.f32.vlgmr.msra.gmra.mxu0 %v125_v8  ;;  %2039 = vmatprep.subr.mxu1 %v2189_v0 }
  0x3f   :  { %2035 = vmatpush3.msra.mxu0 %v2276_v22  ;;  %2036 = vmatprep.mubr.msk.f32.mxu0 %vm2190_vm0, %v2189_v0 }
  0x40   :  { %2032 = vmatmul.mubr.f32.vlgmr.msra.gmra.mxu1 %v125_v8  ;;  %2044 = vmatprep.subr.mxu0 %v2189_v0  ;;  %v1086_v8 = vand.u32 4294901760, %v1085_v7 }
  0x41   :  { %2041 = vmatprep.mubr.msk.f32.mxu1 %vm2190_vm0, %v2189_v0 }
  0x42   :  { %v1087_v9 = vsub.f32 %v1085_v7, %v1086_v8 }
  0x44   :  { %v1088_v10 = vand.u32 4294901760, %v1087_v9 }
  0x46   :  { %2040 = vmatpush3.msra.mxu1 %v1088_v10  ;;  %v47_v10 = vld [vmem:[#allocation2 + $0x1] sm:$0x1] }
  0x47   :  { %2049 = vmatprep.subr.mxu1 %v2189_v0 }
  0xea   :  { %v131_v24 = vpop.f32.mrf.mxu0 }
  0xeb   :  { %v132_v25 = vadd.f32 %v131_v24, %v51_v23  ;;  %v1536_v24 = vsub.f32 %v1534_v17, %v1535_v20 }
  0xec   :  { %v1978_v26 = vpop.f32.mrf.mxu0  ;;  %v207_v27 = vpop.f32.mrf.mxu1 }
  0xed   :  { %v208_v28 = vadd.f32 %v207_v27, %v132_v25  ;;  %v1537_v27 = vand.u32 4294901760, %v1536_v24 }
  0xee   :  { %v281_v29 = vpop.f32.mrf.mxu0  ;;  %v1983_v30 = vpop.f32.mrf.mxu1 }
  0xef   :  { %v282_v31 = vadd.f32 %v281_v29, %v208_v28 }
  0xf0   :  { %v1988_v32 = vpop.f32.mrf.mxu0  ;;  %v355_v33 = vpop.f32.mrf.mxu1 }
  0xf1   :  { %v356_v34 = vadd.f32 %v355_v33, %v282_v31 }
  0xf2   :  { %v429_v35 = vpop.f32.mrf.mxu0  ;;  %v1993_v36 = vpop.f32.mrf.mxu1 }
  0xf3   :  { %v430_v37 = vadd.f32 %v429_v35, %v356_v34 }
  0xf4   :  { %v1998_v38 = vpop.f32.mrf.mxu0  ;;  %v501_v39 = vpop.f32.mrf.mxu1 }
  0xf5   :  { %v502_v40 = vadd.f32 %v501_v39, %v430_v37 }
  0xf6   :  { %v580_v41 = vpop.f32.mrf.mxu0  ;;  %v2003_v43 = vpop.f32.mrf.mxu1 }
  0xf7   :  { %v581_v42 = vadd.f32 %v580_v41, %v51_v23  ;;  %2105 = vtanh.f32 %v502_v40  ;;  %v1876_v43 = vlaneseq }
  0xf8   :  { %v2008_v44 = vpop.f32.mrf.mxu0  ;;  %v656_v45 = vpop.f32.mrf.mxu1 }
  0xf9   :  { %v657_v46 = vadd.f32 %v656_v45, %v581_v42 }
  0xfa   :  { %v730_v47 = vpop.f32.mrf.mxu0  ;;  %v2013_v48 = vpop.f32.mrf.mxu1 }
  0xfb   :  { %v731_v49 = vadd.f32 %v730_v47, %v657_v46 }
  0xfc   :  { %v2018_v50 = vpop.f32.mrf.mxu0  ;;  %v804_v51 = vpop.f32.mrf.mxu1 }
  0xfd   :  { %v805_v52 = vadd.f32 %v804_v51, %v731_v49  ;;  %v1877_v50 = vshrl.u32 %v1876_v43, 7 }
  0xfe   :  { %v878_v53 = vpop.f32.mrf.mxu0  ;;  %v2023_v54 = vpop.f32.mrf.mxu1 }
  0xff   :  { %v879_v55 = vadd.f32 %v878_v53, %v805_v52 }
 0x100   :  { %v2028_v56 = vpop.f32.mrf.mxu0  ;;  %v950_v57 = vpop.f32.mrf.mxu1 }
 0x101   :  { %v951_v58 = vadd.f32 %v950_v57, %v879_v55  ;;  %v46_v55 = vld [vmem:[#allocation2] sm:$0x1]  ;;  %v1878_v57 = vsub.s32 0, %v1877_v50 }
 0x102   :  { %v2033_v59 = vpop.f32.mrf.mxu1 }
 0x103   :  { %2107 = vtanh.f32 %v951_v58 }
 0x104   :  { %v2106_v60 = vpop.eup %2105 }
 0x105   :  { %v956_v61 = vmul.f32 1.442695, %v2106_v60 }
 0x107   :  { %2109 = vpow2.f32 %v956_v61 }
 0x110   :  { %v2108_v62 = vpop.eup %2107 }
 0x111   :  { %v958_v63 = vmul.f32 1.442695, %v2108_v62 }
 0x113   :  { %2111 = vpow2.f32 %v958_v63 }
 0x114   :  { %v2110_v2 = vpop.eup %2109 }
 0x115   :  { %v961_v4 = vsel %vm960_vm2, %v2110_v2, 0.0 }
 0x116   :  { %962 = vadd.xlane.f32.xlu0 %v961_v4 }
 0x120   :  { %v2112_v5 = vpop.eup %2111 }
 0x121   :  { %v964_v6 = vsel %vm960_vm2, %v2112_v5, 0.0 }
 0x122   :  { %965 = vadd.xlane.f32.xlu0 %v964_v6 }
 0x19f   :  { %v963_v11 = vpop.xlane.xlu0 %962 }
 0x1a0   :  { %v967_v12 = vadd.f32 1e-10, %v963_v11 }
 0x1a2   :  { %2113 = vrcp.f32 %v967_v12 }
 0x1ab   :  { %v966_v14 = vpop.xlane.xlu0 %965 }
 0x1ac   :  { %v968_v15 = vadd.f32 1e-10, %v966_v14 }
 0x1ae   :  { %2115 = vrcp.f32 %v968_v15 }
 0x1af   :  { %v2114_v16 = vpop.eup %2113 }
 0x1b0   :  { %v971_v18 = vmul.f32 %v2114_v16, %v2110_v2 }
 0x1b2   :  { %v975_v1 = vsel %vm973_vm3, %v971_v18, 0 }
 0x1b3   :  { %v1043_v19 = vand.u32 4294901760, %v975_v1 }
 0x1b5   :  { %v1044_v21 = vsub.f32 %v975_v1, %v1043_v19  ;;  %2042 = vmatmul.mubr.f32.vlgmr.msra.gmra.mxu1 %v1043_v19 }
 0x1b6   :  { %2050 = vmatpush3.msra.mxu1 %v2276_v22  ;;  %2051 = vmatprep.mubr.msk.f32.mxu1 %vm2190_vm0, %v2189_v0 }
 0x1b7   :  { %v1045_v23 = vand.u32 4294901760, %v1044_v21  ;;  %2059 = vmatprep.subr.mxu1 %v2189_v0 }
 0x1b9   :  { %2052 = vmatmul.mubr.f32.vlgmr.msra.gmra.mxu1 %v1045_v23  ;;  %v1046_v25 = vsub.f32 %v1044_v21, %v1045_v23 }
 0x1ba   :  { %2060 = vmatpush3.msra.mxu1 %v2276_v22  ;;  %2061 = vmatprep.mubr.msk.f32.mxu1 %vm2190_vm0, %v2189_v0 }
 0x1bb   :  { %v2116_v3 = vpop.eup %2115  ;;  %v1047_v26 = vand.u32 4294901760, %v1046_v25  ;;  %2069 = vmatprep.subr.mxu1 %v2189_v0 }
 0x1bc   :  { %v972_v28 = vmul.f32 %v2116_v3, %v2112_v5 }
 0x1bd   :  { %2037 = vmatmul.mubr.f32.vlgmr.msra.gmra.mxu0 %v1047_v26  ;;  %2062 = vmatmul.mubr.f32.vlgmr.msra.gmra.mxu1 %v1043_v19 }
 0x1be   :  { %2045 = vmatpush3.msra.mxu0 %v1085_v7  ;;  %2046 = vmatprep.mubr.msk.f32.mxu0 %vm2190_vm0, %v2189_v0  ;;  %v1424_v29 = vsel %vm973_vm3, %v972_v28, 0 }
 0x1bf   :  { %2070 = vmatpush3.msra.mxu1 %v1537_v27  ;;  %2071 = vmatprep.mubr.msk.f32.mxu1 %vm2190_vm0, %v2189_v0  ;;  %v1492_v22 = vand.u32 4294901760, %v1424_v29 }
 0x1c0   :  { %2054 = vmatprep.subr.mxu0 %v2189_v0  ;;  %2079 = vmatprep.subr.mxu1 %v2189_v0 }
 0x1c1   :  { %2047 = vmatmul.mubr.f32.vlgmr.msra.gmra.mxu0 %v1044_v21  ;;  %v1493_v30 = vsub.f32 %v1424_v29, %v1492_v22  ;;  %2072 = vmatmul.mubr.f32.vlgmr.msra.gmra.mxu1 %v1492_v22 }
 0x1c2   :  { %2055 = vmatpush3.msra.mxu0 %v1086_v8  ;;  %2056 = vmatprep.mubr.msk.f32.mxu0 %vm2190_vm0, %v2189_v0 }
 0x1c3   :  { %2080 = vmatpush3.msra.mxu1 %v1457_v13  ;;  %2081 = vmatprep.mubr.msk.f32.mxu1 %vm2190_vm0, %v2189_v0  ;;  %v1494_v31 = vand.u32 4294901760, %v1493_v30 }
 0x1c4   :  { %2064 = vmatprep.subr.mxu0 %v2189_v0  ;;  %2089 = vmatprep.subr.mxu1 %v2189_v0 }
 0x1c5   :  { %2057 = vmatmul.mubr.f32.vlgmr.msra.gmra.mxu0 %v1043_v19  ;;  %2082 = vmatmul.mubr.f32.vlgmr.msra.gmra.mxu1 %v1494_v31  ;;  %v1495_v32 = vsub.f32 %v1493_v30, %v1494_v31 }
 0x1c6   :  { %2065 = vmatpush3.msra.mxu0 %v1457_v13  ;;  %2066 = vmatprep.mubr.msk.f32.mxu0 %vm2190_vm0, %v2189_v0 }
 0x1c7   :  { %2090 = vmatpush3.msra.mxu1 %v1457_v13  ;;  %2091 = vmatprep.mubr.msk.f32.mxu1 %vm2190_vm0, %v2189_v0  ;;  %v1496_v33 = vand.u32 4294901760, %v1495_v32 }
 0x1c8   :  { %2074 = vmatprep.subr.mxu0 %v2189_v0 }
 0x1c9   :  { %2067 = vmatmul.mubr.f32.vlgmr.msra.gmra.mxu0 %v1496_v33  ;;  %2092 = vmatmul.mubr.f32.vlgmr.msra.gmra.mxu1 %v1492_v22 }
 0x1ca   :  { %2075 = vmatpush3.msra.mxu0 %v1534_v17  ;;  %2076 = vmatprep.mubr.msk.f32.mxu0 %vm2190_vm0, %v2189_v0 }
 0x1cb   :  { %2084 = vmatprep.subr.mxu0 %v2189_v0 }
 0x1cd   :  { %2077 = vmatmul.mubr.f32.vlgmr.msra.gmra.mxu0 %v1493_v30 }
 0x1ce   :  { %2085 = vmatpush3.msra.mxu0 %v1535_v20  ;;  %2086 = vmatprep.mubr.msk.f32.mxu0 %vm2190_vm0, %v2189_v0 }
 0x1d1   :  { %2087 = vmatmul.mubr.f32.vlgmr.msra.gmra.mxu0 %v1492_v22 }
 0x275   :  { %v1125_v34 = vpop.f32.mrf.mxu1 }
 0x277   :  { %v2043_v35 = vpop.f32.mrf.mxu1 }
 0x279   :  { %v1273_v36 = vpop.f32.mrf.mxu1 }
 0x27b   :  { %v2053_v37 = vpop.f32.mrf.mxu1 }
 0x27d   :  { %v1049_v38 = vpop.f32.mrf.mxu0  ;;  %v1419_v39 = vpop.f32.mrf.mxu1 }
 0x27e   :  { %v1126_v42 = vadd.f32 %v1125_v34, %v1049_v38 }
 0x27f   :  { %v2038_v40 = vpop.f32.mrf.mxu0  ;;  %v2063_v41 = vpop.f32.mrf.mxu1 }
 0x281   :  { %v1199_v44 = vpop.f32.mrf.mxu0  ;;  %v1574_v45 = vpop.f32.mrf.mxu1 }
 0x282   :  { %v1200_v46 = vadd.f32 %v1199_v44, %v1126_v42 }
 0x283   :  { %v2048_v47 = vpop.f32.mrf.mxu0  ;;  %v2073_v48 = vpop.f32.mrf.mxu1 }
 0x284   :  { %v1274_v49 = vadd.f32 %v1273_v36, %v1200_v46 }
 0x285   :  { %v1347_v51 = vpop.f32.mrf.mxu0  ;;  %v1722_v0 = vpop.f32.mrf.mxu1 }
 0x286   :  { %v1348_v52 = vadd.f32 %v1347_v51, %v1274_v49 }
 0x287   :  { %v2058_v53 = vpop.f32.mrf.mxu0  ;;  %v2083_v54 = vpop.f32.mrf.mxu1 }
 0x288   :  { %v1420_v56 = vadd.f32 %v1419_v39, %v1348_v52 }
 0x289   :  { %v1498_v58 = vpop.f32.mrf.mxu0  ;;  %v1868_v59 = vpop.f32.mrf.mxu1 }
 0x28a   :  { %1892 = vrot.lane.b32.xlu0 %v1420_v56, %s2191_s3  ;;  %v1872_v60 = vmul.f32 %v1420_v56, %v46_v55  ;;  %v1575_v63 = vadd.f32 %v1574_v45, %v1498_v58 }
 0x28b   :  { %v2068_v61 = vpop.f32.mrf.mxu0  ;;  %v2093_v62 = vpop.f32.mrf.mxu1 }
 0x28c   :  { %v1879_v2 = vrot.slane %v1872_v60, %v1878_v57 }
 0x28d   :  { %v1648_v4 = vpop.f32.mrf.mxu0 }
 0x28e   :  { %v1649_v5 = vadd.f32 %v1648_v4, %v1575_v63  ;;  %1884 = vrot.lane.b32.xlu1 %v1879_v2, %s2192_s30 }
 0x28f   :  { %v2078_v6 = vpop.f32.mrf.mxu0 }
 0x290   :  { %v1723_v7 = vadd.f32 %v1722_v0, %v1649_v5 }
 0x291   :  { %v1796_v8 = vpop.f32.mrf.mxu0 }
 0x292   :  { %v1797_v9 = vadd.f32 %v1796_v8, %v1723_v7 }
 0x293   :  { %v2088_v11 = vpop.f32.mrf.mxu0 }
 0x294   :  { %v1869_v12 = vadd.f32 %v1868_v59, %v1797_v9 }
 0x296   :  { %v1873_v13 = vmul.f32 %v1869_v12, %v47_v10 }
 0x298   :  { %v1883_v14 = vrot.slane %v1873_v13, %v1878_v57 }
 0x29a   :  { %1886 = vrot.lane.b32.xlu1 %v1883_v14, %s2192_s30 }
 0x29e   :  { %1894 = vrot.lane.b32.xlu1 %v1869_v12, %s2191_s3 }
 0x2fc   :  { %v1893_v16 = vpop.permute.xlu0 %1892 }
 0x300   :  { %v1885_v15 = vpop.permute.xlu1 %1884 }
 0x301   :  { %v1898_v17 = vsel %vm52_vm1, %v46_v55, %v1885_v15 }
 0x302   :  { %v1901_v18 = vsel %vm1900_vm4, %v1898_v17, %v1893_v16 }
 0x303   :  { %v1904_v1 = vsel %vm1903_vm5, %v1901_v18, 0.0 }
 0x304   :  { %1906 = vst [vmem:[#allocation7] sm:$0x1] %v1904_v1 }
 0x30c   :  { %v1887_v19 = vpop.permute.xlu1 %1886 }
 0x30d   :  { %v1899_v20 = vsel %vm52_vm1, %v47_v10, %v1887_v19 }
 0x310   :  { %v1895_v21 = vpop.permute.xlu1 %1894 }
 0x311   :  { %v1902_v23 = vsel %vm1900_vm4, %v1899_v20, %v1895_v21 }
 0x312   :  { %v1905_v24 = vsel %vm1903_vm5, %v1902_v23, 0.0 }
 0x313   :  { %1907 = vst [vmem:[#allocation7 + $0x1] sm:$0x1] %v1905_v24 }
 0x314   :  { %2168 = shalt.err (!%p2165_p0)
}
 0x315   :  { %1919 = dma.vmem_to_hbm [thread:$0]  %s1914_s6, 32, %s2339_s4, [#allocation4], %s2184_s18, %s2184_s18, %s2185_s19  }
 0x316   :  { %2181 = dma.done.wait [#allocation4], 32  }
 0x317   :  { %2182 = vsyncadd [#allocation4], 4294967264 }
 0x318   :  { %1923 = vsyncpa [#allocation3], 1 }
 0x319   :  { %1924 = vsyncpa [#allocation6], 1 }
 0x31a   :  { %1925 = vsyncpa [#allocation4], 1 }

</bundles_post_ra>
